<compile_context>
chip_gen: v6e
topology: v6e:2x2x1
jax: 0.10.0
libtpu: 0.0.40
codegen_flags: <defaults>
</compile_context>

<pallas_src>
import jax
import jax.numpy as jnp
from jax.experimental import pallas as pl
from jax.experimental.pallas import tpu as pltpu

_LANE = 128
_WIDTH_CANDIDATES = (4096, 2048, 1024, 512, 256, 128)   # wide, lane-dense last dims


def _silu_kernel(x_ref, o_ref):
    # Upcast to f32: extra VPU converts are free filler on an HBM-bound kernel,
    # and this matches the f32 reference numerics for bf16/fp16 inputs.
    x = x_ref[...].astype(jnp.float32)
    # sigmoid(x) == 0.5 * (tanh(0.5 * x) + 1): a single EUP transcendental per element.
    sig = 0.5 * (jnp.tanh(0.5 * x) + 1.0)
    o_ref[...] = (x * sig).astype(o_ref.dtype)


def _chip_config():
    """(target_block_bytes, vmem_limit_bytes) tuned per TPU generation."""
    try:
        kind = jax.devices()[0].device_kind.lower()
    except Exception:  # pragma: no cover
        kind = ""
    if "v7" in kind:
        # ~3.2 TB/s HBM: bigger blocks to amortize step overhead; 64 MiB physical VMEM.
        return 6 * 1024 * 1024, 48 * 1024 * 1024
    if "v6" in kind:
        # 1.4 TB/s HBM, 128 MiB physical VMEM.
        return 4 * 1024 * 1024, 64 * 1024 * 1024
    if "v5" in kind:
        # v5e: 2-4 MiB already near roofline; 4 MiB needs an explicit limit (16 MiB default).
        return 4 * 1024 * 1024, 48 * 1024 * 1024
    return 4 * 1024 * 1024, 48 * 1024 * 1024


def _sublane_tile(dtype):
    """Dtype-native sublane tile: 8 for f32, 16 for bf16/fp16, 32 for int8/fp8."""
    return max(8, 32 // jnp.dtype(dtype).itemsize)


def _pick_width(n, sublane):
    """Largest wide lane-dense width dividing n, preferring >= one sublane tile of rows."""
    for w in _WIDTH_CANDIDATES:
        if n % w == 0 and n // w >= sublane:
            return w
    for w in _WIDTH_CANDIDATES:
        if n % w == 0:
            return w
    return None


def _silu_2d(x2d, block_bytes, vmem_limit):
    rows, width = x2d.shape
    itemsize = jnp.dtype(x2d.dtype).itemsize
    sublane = _sublane_tile(x2d.dtype)

    # Rows per block targeting ~block_bytes; multiple of the dtype-native sublane tile.
    tr = max(sublane, (block_bytes // (width * itemsize)) // sublane * sublane)
    if tr >= rows:
        if rows >= 2 * sublane:
            # Split into >= 2 blocks so both v7x TensorCores (parallel grid axis) get work.
            tr = pl.cdiv(pl.cdiv(rows, 2), sublane) * sublane
        else:
            tr = rows  # block dim == full array dim: always legal, single block
    grid = (pl.cdiv(rows, tr),)  # clipped tail block if rows % tr != 0

    n = rows * width
    return pl.pallas_call(
        _silu_kernel,
        out_shape=jax.ShapeDtypeStruct((rows, width), x2d.dtype),
        grid_spec=pltpu.PrefetchScalarGridSpec(
            num_scalar_prefetch=0,
            grid=grid,
            in_specs=[pl.BlockSpec((tr, width), lambda i: (i, 0))],
            out_specs=pl.BlockSpec((tr, width), lambda i: (i, 0)),
        ),
        compiler_params=pltpu.CompilerParams(
            dimension_semantics=("parallel",),
            vmem_limit_bytes=vmem_limit,
        ),
        cost_estimate=pl.CostEstimate(
            flops=4 * n,
            transcendentals=n,
            bytes_accessed=2 * n * itemsize,
        ),
    )(x2d)


def silu(x: jax.Array) -> jax.Array:
    """Elementwise SiLU. Layout-agnostic (NCHW or anything else)."""
    orig_shape = x.shape
    n = x.size
    if n == 0:
        return x

    dtype = x.dtype
    sublane = _sublane_tile(dtype)
    block_bytes, vmem_limit = _chip_config()

    width = _pick_width(n, sublane)
    if width is not None:
        # Fast path: free reshapes (contiguous, row-major) into a lane-dense slab.
        x2d = x.reshape(n // width, width)
        return _silu_2d(x2d, block_bytes, vmem_limit).reshape(orig_shape)

    # Ragged fallback (total size not a multiple of 128): run the Pallas kernel on the
    # 128-aligned prefix and compute the (<128-element) tail with plain jnp. Avoids the
    # extra full-array pad + slice HBM passes of the previous version.
    x_flat = x.reshape(-1)
    head_n = n - (n % _LANE)
    tail = x_flat[head_n:].astype(jnp.float32)
    tail_out = (tail * jax.nn.sigmoid(tail)).astype(dtype)
    if head_n == 0:
        return tail_out.reshape(orig_shape)
    w = _pick_width(head_n, sublane)
    head_out = _silu_2d(
        x_flat[:head_n].reshape(head_n // w, w), block_bytes, vmem_limit
    ).reshape(-1)
    return jnp.concatenate([head_out, tail_out]).reshape(orig_shape)


def silu_ref(x):
    xf = x.astype(jnp.float32)
    return (xf * jax.nn.sigmoid(xf)).astype(x.dtype)


if __name__ == "__main__":
    key = jax.random.PRNGKey(0)

    # Primary test: NCHW f32 input consistent with the module.
    x = jax.random.normal(key, (2, 4, 16, 16), dtype=jnp.float32)
    y = silu(x)
    jax.block_until_ready(y)
    y_ref = silu_ref(x)
    assert y.shape == x.shape and y.dtype == x.dtype
    assert jnp.allclose(y, y_ref, atol=1e-5, rtol=1e-5)

    # bf16 path (kernel upcasts to f32 internally, matching the f32 reference).
    xb = jax.random.normal(jax.random.PRNGKey(1), (2, 4, 16, 16), dtype=jnp.bfloat16)
    yb = silu(xb)
    jax.block_until_ready(yb)
    yb_ref = silu_ref(xb)
    assert yb.dtype == xb.dtype
    assert jnp.allclose(yb.astype(jnp.float32), yb_ref.astype(jnp.float32),
                        atol=2e-2, rtol=2e-2)

    # Ragged path (size not a multiple of 128): prefix kernel + jnp tail.
    xr = jax.random.normal(jax.random.PRNGKey(2), (2, 3, 67), dtype=jnp.float32)
    yr = silu(xr)
    jax.block_until_ready(yr)
    assert jnp.allclose(yr, silu_ref(xr), atol=1e-5, rtol=1e-5)

    print("KERNEL_OK")
</pallas_src>

<mosaic_0001>
module attributes {stable_mosaic.version = 11 : i64} {
  func.func @_silu_kernel(%arg0: i32, %arg1: memref<8x256xf32, #tpu.memory_space<vmem>>, %arg2: memref<8x256xf32, #tpu.memory_space<vmem>>) attributes {dimension_semantics = [#tpu.dimension_semantics<parallel>], iteration_bounds = array<i64: 1>, scalar_prefetch = 0 : i64, scratch_operands = 0 : i64, tpu.core_type = #tpu.core_type<tc>, window_params = [{transform_indices = @transform_0, window_bounds = array<i64: 8, 256>}, {transform_indices = @transform_1, window_bounds = array<i64: 8, 256>}]} {
    %c0 = arith.constant 0 : index
    %c0_0 = arith.constant 0 : index
    %0 = vector.load %arg1[%c0, %c0_0] : memref<8x256xf32, #tpu.memory_space<vmem>>, vector<8x256xf32>
    %cst = arith.constant 5.000000e-01 : f32
    %1 = vector.broadcast %cst : f32 to vector<8x256xf32>
    %2 = arith.mulf %1, %0 : vector<8x256xf32>
    %3 = math.tanh %2 : vector<8x256xf32>
    %cst_1 = arith.constant 1.000000e+00 : f32
    %4 = vector.broadcast %cst_1 : f32 to vector<8x256xf32>
    %5 = arith.addf %3, %4 : vector<8x256xf32>
    %cst_2 = arith.constant 5.000000e-01 : f32
    %6 = vector.broadcast %cst_2 : f32 to vector<8x256xf32>
    %7 = arith.mulf %6, %5 : vector<8x256xf32>
    %8 = arith.mulf %0, %7 : vector<8x256xf32>
    %c0_3 = arith.constant 0 : index
    %c0_4 = arith.constant 0 : index
    %9 = vector.load %arg2[%c0_3, %c0_4] : memref<8x256xf32, #tpu.memory_space<vmem>>, vector<8x256xf32>
    tpu.vector_store %arg2[%c0_3, %c0_4], %8 {strides = array<i32>} : memref<8x256xf32, #tpu.memory_space<vmem>>, vector<8x256xf32>,
    return
  }
  func.func @transform_0(%arg0: i32) -> (i32, i32) {
    %c0_i32 = arith.constant 0 : i32
    %c0_i32_0 = arith.constant 0 : i32
    return %arg0, %c0_i32 : i32, i32
  }
  func.func @transform_1(%arg0: i32) -> (i32, i32) {
    %c0_i32 = arith.constant 0 : i32
    %c0_i32_0 = arith.constant 0 : i32
    return %arg0, %c0_i32 : i32, i32
  }
}

</mosaic_0001>

<bundles_post_ra>
// kernel: tpu_custom_call.1
= control target key start
LH: loop header
LB: loop body
LE: loop exit
PB: predicated region body
PF: predicated region fallthrough
CT: control target
= control target key end

     0   :  { %6 = vsyncpa [#allocation3], 0  ;;  %s118_s0 = inlined_call_operand.hbm [shape: f32[8,256], index: 0, kind: input, shape index: {}]   ;;  %s119_s1 = inlined_call_operand.hbm [shape: f32[8,256], index: 1, kind: output, shape index: {}]  }
   0x1   :  { %7 = vsyncpa [#allocation4], 0  ;;  %s100_s6 = smov [#allocation2]  }
   0x2   :  { %s14_s7 = sshll.u32 %s100_s6, 4  ;;  %s15_s7 = int_to_ptr.vmem [resolvable:$true] %s14_s7 }
   0x3   :  { %s64_s8 = scalar_lea.vmem %s15_s7, 256  ;;  %p69_p1 = scmp.lt.s32.totalorder %s15_s7, %s15_s7 }
   0x4   :  { %p65_p0 = scmp.ne.s32.totalorder %s15_s7, %s64_s8  ;;  %p70_p2 = scmp.lt.s32.totalorder %s64_s8, %s64_s8 }
   0x6   :  { %p71_p3 = por %p70_p2, %p69_p1 }
   0x8   :  { %p72_p4 = pnand %p71_p3, %p65_p0 }
   0xa   :  { %75 = shalt.err (!%p72_p4)
}
   0xb   :  { %17 = dma.hbm_to_vmem [thread:$0]  %s118_s0, 256, %s15_s7, [#allocation3]  }
   0xc   :  { %96 = dma.done.wait [#allocation3], 256  }
   0xd   :  { %97 = vsyncadd [#allocation3], 4294967040  ;;  %v21_v0 = vld [vmem:[#allocation2] sm:$0xff]  ;;  %v22_v1 = vld [vmem:[#allocation2 + $0x8] sm:$0xff]  ;;  %s101_s11 = smov [#allocation5]  }
   0xe   :  { %v23_v2 = vmul.f32 0.5, %v21_v0  ;;  %v24_v3 = vmul.f32 0.5, %v22_v1  ;;  %s41_s12 = sshll.u32 %s101_s11, 4  ;;  %s42_s12 = int_to_ptr.vmem [resolvable:$true] %s41_s12 }
   0xf   :  { %s76_s0 = scalar_lea.vmem %s42_s12, 256  ;;  %p81_p6 = scmp.lt.s32.totalorder %s42_s12, %s42_s12 }
  0x10   :  { %52 = vtanh.f32 %v23_v2  ;;  %p77_p5 = scmp.ne.s32.totalorder %s42_s12, %s76_s0  ;;  %p82_p7 = scmp.lt.s32.totalorder %s76_s0, %s76_s0 }
  0x11   :  { %54 = vtanh.f32 %v24_v3 }
  0x12   :  { %p83_p8 = por %p82_p7, %p81_p6 }
  0x14   :  { %p84_p9 = pnand %p83_p8, %p77_p5 }
  0x1d   :  { %v53_v4 = vpop.eup %52 }
  0x1e   :  { %v55_v5 = vpop.eup %54  ;;  %v27_v6 = vadd.f32 1.0, %v53_v4 }
  0x1f   :  { %v28_v7 = vadd.f32 1.0, %v55_v5 }
  0x20   :  { %v29_v8 = vmul.f32 0.5, %v27_v6 }
  0x21   :  { %v30_v9 = vmul.f32 0.5, %v28_v7 }
  0x22   :  { %v31_v10 = vmul.f32 %v29_v8, %v21_v0 }
  0x23   :  { %v32_v11 = vmul.f32 %v30_v9, %v22_v1 }
  0x24   :  { %33 = vst [vmem:[#allocation5] sm:$0xff] %v31_v10 }
  0x25   :  { %34 = vst [vmem:[#allocation5 + $0x8] sm:$0xff] %v32_v11 }
  0x26   :  { %87 = shalt.err (!%p84_p9)
}
  0x27   :  { %44 = dma.vmem_to_hbm [thread:$0]  %s42_s12, 256, %s119_s1, [#allocation4]  }
  0x28   :  { %98 = dma.done.wait [#allocation4], 256  }
  0x29   :  { %99 = vsyncadd [#allocation4], 4294967040 }
  0x2a   :  { %48 = vsyncpa [#allocation3], 1 }
  0x2b   :  { %49 = vsyncpa [#allocation4], 1 }

</bundles_post_ra>
